<compile_context>
chip_gen: v7x
topology: tpu7x:2x2x1
jax: 0.10.0
libtpu: 0.0.40
codegen_flags: <defaults>
</compile_context>

<pallas_src>
import functools

import jax
import jax.numpy as jnp
from jax.experimental import pallas as pl
from jax.experimental.pallas import tpu as pltpu

_NEG_BIG = -1e30  # bias padding value for padded vocab columns


def _round_up(x, m):
    return (x + m - 1) // m * m


def _vmem_limit_bytes():
    try:
        cap = int(pltpu.get_tpu_info().vmem_capacity_bytes)
    except Exception:
        cap = 64 << 20  # conservative default (v7x per-core VMEM)
    return (cap * 3) // 4


_VMEM_LIMIT = _vmem_limit_bytes()


def _auto_vocab_tile(d_model, d_vocab, cbytes, budget):
    """Vocab tile: multiple of 256 (MXU N width on v6e/v7x), sized so the
    double-buffered (d_model, tn) weight tile uses <= ~1/4 of the budget."""
    cap = (budget // 4) // max(1, 2 * d_model * cbytes)
    cap = max(256, (cap // 256) * 256)
    want = max(256, _round_up(d_vocab, 256))
    return int(min(2048, cap, want))


# ------------------------------ kernels ------------------------------------


def _generator_kernel(x_ref, w_ref, b_ref, o_ref):
    """Single-pass (small/medium vocab): full vocab row per grid step.

    x:(tm,d) bf16, w:(d,V) bf16, b:(1,V) f32 -> o:(tm,V) out_dtype.
    """
    logits = jnp.dot(x_ref[...], w_ref[...], preferred_element_type=jnp.float32)
    logits = logits + b_ref[...]
    m = jnp.max(logits, axis=-1, keepdims=True)
    shifted = logits - m
    lse = jnp.log(jnp.sum(jnp.exp(shifted), axis=-1, keepdims=True))
    o_ref[...] = (shifted - lse).astype(o_ref.dtype)


def _generator_tiled_kernel(x_ref, w_ref, b_ref, o_ref, m_sc, l_sc):
    """Vocab-tiled fused log_softmax.

    Grid = (row blocks, vocab blocks).  The (tm, V_pad) output block is
    resident in VMEM across the vocab axis: each step stages its raw logits
    slice into it and updates the online (max, sum-exp); the last step
    subtracts the logsumexp in place.  No HBM round trip for the logits.
    """
    j = pl.program_id(1)
    tn = w_ref.shape[1]

    @pl.when(j == 0)
    def _():
        m_sc[...] = jnp.full_like(m_sc, -jnp.inf)
        l_sc[...] = jnp.zeros_like(l_sc)

    logits = jnp.dot(x_ref[...], w_ref[...], preferred_element_type=jnp.float32)
    logits = logits + b_ref[...]

    col = pl.multiple_of(j * tn, tn)
    o_ref[:, pl.ds(col, tn)] = logits.astype(o_ref.dtype)

    m_prev = m_sc[...]
    m_new = jnp.maximum(m_prev, jnp.max(logits, axis=-1, keepdims=True))
    l_sc[...] = l_sc[...] * jnp.exp(m_prev - m_new) + jnp.sum(
        jnp.exp(logits - m_new), axis=-1, keepdims=True
    )
    m_sc[...] = m_new

    @pl.when(j == pl.num_programs(1) - 1)
    def _():
        lse = m_sc[...] + jnp.log(l_sc[...])
        # Finalize in tn-wide chunks to bound the f32 temporary (static loop).
        for t in range(o_ref.shape[1] // tn):
            sl = pl.ds(t * tn, tn)
            o_ref[:, sl] = (o_ref[:, sl].astype(jnp.float32) - lse).astype(o_ref.dtype)


# ------------------------------ wrapper -------------------------------------


@functools.partial(
    jax.jit, static_argnames=("tm", "vocab_tile", "compute_dtype", "out_dtype")
)
def generator_forward(x, w_t, b, *, tm=256, vocab_tile=None,
                      compute_dtype=jnp.bfloat16, out_dtype=jnp.float32):
    """log_softmax(x @ w_t + b, axis=-1).

    x: (..., d_model); w_t: (d_model, d_vocab) = transpose of the torch weight;
    b: (d_vocab,).
    """
    d_model, d_vocab = w_t.shape
    lead_shape = x.shape[:-1]

    xm = x.reshape(-1, d_model)
    M = xm.shape[0]

    cbytes = jnp.dtype(compute_dtype).itemsize
    obytes = jnp.dtype(out_dtype).itemsize

    # Row tile: multiple of 16 (bf16 sublane packing), clamped to the data.
    tm_eff = max(16, min(_round_up(tm, 16), _round_up(M, 16)))
    # Keep >= 2 row blocks when possible so both v7x TensorCores get work.
    while tm_eff > 16 and pl.cdiv(M, tm_eff) < 2 and M > tm_eff // 2:
        tm_eff = max(16, _round_up(tm_eff // 2, 16))

    def _single_pass_bytes(rows):
        # Conservative: the grid-invariant weight/bias are counted double-
        # buffered (they are DMA'd once, but default pipelining allocates 2).
        return (2 * rows * d_model * cbytes
                + 2 * d_model * d_vocab * cbytes
                + 2 * d_vocab * 4
                + 2 * rows * d_vocab * obytes
                + 2 * rows * d_vocab * 4)

    if vocab_tile is not None:
        assert vocab_tile % 128 == 0, "vocab_tile must be a multiple of 128"
        use_tiled = True
        tn = int(vocab_tile)
    else:
        use_tiled = _single_pass_bytes(tm_eff) > _VMEM_LIMIT
        tn = _auto_vocab_tile(d_model, d_vocab, cbytes, _VMEM_LIMIT) if use_tiled else None

    if use_tiled:
        v_pad = _round_up(d_vocab, tn)

        def _tiled_bytes(rows):
            return (2 * rows * d_model * cbytes      # x tiles (double-buffered)
                    + 2 * d_model * tn * cbytes      # weight tiles
                    + 2 * tn * 4                     # bias tiles
                    + 2 * rows * v_pad * obytes      # resident output block
                    + 2 * rows * tn * 4              # f32 logits temporaries
                    + 4 * rows * 4)                  # running max / sum-exp
        while tm_eff > 16 and _tiled_bytes(tm_eff) > _VMEM_LIMIT:
            tm_eff = max(16, _round_up(tm_eff // 2, 16))
        # TODO(synk): astronomically large d_vocab*out_dtype can still exceed
        # VMEM at tm=16; would need a chunked second vocab sweep (not needed
        # for realistic vocab sizes).

    M_pad = _round_up(M, tm_eff)
    # Row-pad first, then cast: XLA fuses the convert into the pad consumer,
    # so x is materialized once, not twice.
    if M_pad != M:
        xm = jnp.pad(xm, ((0, M_pad - M), (0, 0)))
    xm = xm.astype(compute_dtype)
    wt_c = w_t.astype(compute_dtype)
    b2 = b.astype(jnp.float32).reshape(1, d_vocab)   # bias cast hoisted out of kernel

    if not use_tiled:
        cost = pl.CostEstimate(
            flops=2 * M_pad * d_model * d_vocab,
            transcendentals=M_pad * d_vocab,
            bytes_accessed=(M_pad * d_model * cbytes
                            + d_model * d_vocab * cbytes
                            + d_vocab * 4
                            + M_pad * d_vocab * obytes),
        )
        out = pl.pallas_call(
            _generator_kernel,
            out_shape=jax.ShapeDtypeStruct((M_pad, d_vocab), out_dtype),
            grid_spec=pltpu.PrefetchScalarGridSpec(
                num_scalar_prefetch=0,
                grid=(M_pad // tm_eff,),
                in_specs=[
                    pl.BlockSpec((tm_eff, d_model), lambda i: (i, 0)),
                    # Constant index_map -> DMA'd only once across the grid.
                    pl.BlockSpec((d_model, d_vocab), lambda i: (0, 0)),
                    pl.BlockSpec((1, d_vocab), lambda i: (0, 0)),
                ],
                out_specs=pl.BlockSpec((tm_eff, d_vocab), lambda i: (i, 0)),
            ),
            compiler_params=pltpu.CompilerParams(
                dimension_semantics=("parallel",),
                vmem_limit_bytes=_VMEM_LIMIT,
            ),
            cost_estimate=cost,
        )(xm, wt_c, b2)
        out = out[:M]
    else:
        # Pad the vocab so any vocab size is tileable; padded bias columns get
        # a huge negative value so they contribute nothing to the softmax.
        if v_pad != d_vocab:
            wt_c = jnp.pad(wt_c, ((0, 0), (0, v_pad - d_vocab)))
            b2 = jnp.pad(b2, ((0, 0), (0, v_pad - d_vocab)),
                         constant_values=_NEG_BIG)

        grid = (M_pad // tm_eff, v_pad // tn)
        cost = pl.CostEstimate(
            flops=2 * M_pad * d_model * v_pad,
            transcendentals=M_pad * v_pad,
            bytes_accessed=(M_pad * d_model * cbytes
                            + grid[0] * d_model * v_pad * cbytes  # W re-read / row tile
                            + v_pad * 4
                            + M_pad * v_pad * obytes),
        )
        out = pl.pallas_call(
            _generator_tiled_kernel,
            out_shape=jax.ShapeDtypeStruct((M_pad, v_pad), out_dtype),
            grid_spec=pltpu.PrefetchScalarGridSpec(
                num_scalar_prefetch=0,
                grid=grid,
                in_specs=[
                    pl.BlockSpec((tm_eff, d_model), lambda i, j: (i, 0)),
                    pl.BlockSpec((d_model, tn), lambda i, j: (0, j)),
                    pl.BlockSpec((1, tn), lambda i, j: (0, j)),
                ],
                # Output block resident across the vocab axis (written on the
                # last vocab step) -> no logits round trip through HBM.
                out_specs=pl.BlockSpec((tm_eff, v_pad), lambda i, j: (i, 0)),
                scratch_shapes=[
                    pltpu.VMEM((tm_eff, 1), jnp.float32),  # running max
                    pltpu.VMEM((tm_eff, 1), jnp.float32),  # running sum-exp
                ],
            ),
            compiler_params=pltpu.CompilerParams(
                dimension_semantics=("parallel", "arbitrary"),
                vmem_limit_bytes=_VMEM_LIMIT,
            ),
            cost_estimate=cost,
        )(xm, wt_c, b2)
        out = out[:M, :d_vocab]

    return out.reshape(*lead_shape, d_vocab)


# ------------------------------ reference & test ----------------------------


def _reference(x, w_t, b, compute_dtype=jnp.bfloat16):
    # Same bf16 rounding of the matmul operands as the kernel, f32 accumulate.
    xc = x.astype(compute_dtype).astype(jnp.float32)
    wc = w_t.astype(compute_dtype).astype(jnp.float32)
    logits = jnp.einsum("...d,dv->...v", xc, wc,
                        precision=jax.lax.Precision.HIGHEST) + b.astype(jnp.float32)
    return jax.nn.log_softmax(logits, axis=-1)


if __name__ == "__main__":
    key = jax.random.PRNGKey(0)
    kx1, kx2, kw1, kb1, kw2, kb2 = jax.random.split(key, 6)

    # --- test 1: small shapes -> single-pass fused kernel -------------------
    batch, seq, d_model, d_vocab = 2, 8, 32, 128
    bound = 1.0 / (d_model ** 0.5)
    x1 = jax.random.normal(kx1, (batch, seq, d_model), dtype=jnp.float32)
    w1 = jax.random.uniform(kw1, (d_model, d_vocab), minval=-bound,
                            maxval=bound, dtype=jnp.float32)
    b1 = jax.random.uniform(kb1, (d_vocab,), minval=-bound, maxval=bound,
                            dtype=jnp.float32)

    out1 = jax.block_until_ready(generator_forward(x1, w1, b1))
    ref1 = _reference(x1, w1, b1)
    assert out1.shape == (batch, seq, d_vocab)
    assert jnp.allclose(out1, ref1, atol=2e-3, rtol=2e-3), "single-pass mismatch"

    # --- test 2: force the fused vocab-tiled path (incl. vocab padding) -----
    batch2, seq2, d_vocab2 = 2, 10, 640   # M=20 exercises row padding + 2 row blocks
    x2 = jax.random.normal(kx2, (batch2, seq2, d_model), dtype=jnp.float32)
    w2 = jax.random.uniform(kw2, (d_model, d_vocab2), minval=-bound,
                            maxval=bound, dtype=jnp.float32)
    b2 = jax.random.uniform(kb2, (d_vocab2,), minval=-bound, maxval=bound,
                            dtype=jnp.float32)

    # vocab_tile=256 -> d_vocab padded 640 -> 768, 3 vocab steps, online LSE.
    out2 = jax.block_until_ready(generator_forward(x2, w2, b2, vocab_tile=256))
    ref2 = _reference(x2, w2, b2)
    assert out2.shape == (batch2, seq2, d_vocab2)
    assert jnp.allclose(out2, ref2, atol=2e-3, rtol=2e-3), "tiled-path mismatch"

    print("KERNEL_OK")
</pallas_src>

<mosaic_0001>
module attributes {stable_mosaic.version = 11 : i64} {
  func.func @_generator_kernel(%arg0: i32, %arg1: memref<16x32xbf16, #tpu.memory_space<vmem>>, %arg2: memref<32x128xbf16, #tpu.memory_space<vmem>>, %arg3: memref<1x128xf32, #tpu.memory_space<vmem>>, %arg4: memref<16x128xf32, #tpu.memory_space<vmem>>) attributes {dimension_semantics = [#tpu.dimension_semantics<parallel>], iteration_bounds = array<i64: 1>, scalar_prefetch = 0 : i64, scratch_operands = 0 : i64, tpu.core_type = #tpu.core_type<tc>, window_params = [{transform_indices = @transform_0, window_bounds = array<i64: 16, 32>}, {pipeline_mode = #tpu.pipeline_mode<synchronous>, transform_indices = @transform_1, window_bounds = array<i64: 32, 128>}, {pipeline_mode = #tpu.pipeline_mode<synchronous>, transform_indices = @transform_2, window_bounds = array<i64: 1, 128>}, {transform_indices = @transform_3, window_bounds = array<i64: 16, 128>}]} {
    %c0 = arith.constant 0 : index
    %c0_0 = arith.constant 0 : index
    %0 = vector.load %arg1[%c0, %c0_0] : memref<16x32xbf16, #tpu.memory_space<vmem>>, vector<16x32xbf16>
    %c0_1 = arith.constant 0 : index
    %c0_2 = arith.constant 0 : index
    %1 = vector.load %arg2[%c0_1, %c0_2] : memref<32x128xbf16, #tpu.memory_space<vmem>>, vector<32x128xbf16>
    %cst = arith.constant dense<0.000000e+00> : vector<16x128xf32>
    %2 = tpu.matmul %0, %1, %cst {dimension_numbers = #tpu.dot_dimension_numbers<[1], [0], [0], [1], [0, 0, 1, 1], [], []>} : vector<16x32xbf16>, vector<32x128xbf16>, vector<16x128xf32> -> vector<16x128xf32>
    %c0_3 = arith.constant 0 : index
    %c0_4 = arith.constant 0 : index
    %3 = vector.load %arg3[%c0_3, %c0_4] : memref<1x128xf32, #tpu.memory_space<vmem>>, vector<1x128xf32>
    %4 = vector.broadcast %3 : vector<1x128xf32> to vector<16x128xf32>
    %5 = arith.addf %2, %4 : vector<16x128xf32>
    %cst_5 = arith.constant dense<0xFF800000> : vector<16xf32>
    %6 = vector.multi_reduction <maximumf>, %5, %cst_5 [1] : vector<16x128xf32> to vector<16xf32>
    %7 = vector.shape_cast %6 : vector<16xf32> to vector<16x1xf32>
    %8 = vector.broadcast %7 : vector<16x1xf32> to vector<16x128xf32>
    %9 = arith.subf %5, %8 : vector<16x128xf32>
    %10 = math.exp %9 : vector<16x128xf32>
    %cst_6 = arith.constant dense<0.000000e+00> : vector<16xf32>
    %11 = vector.multi_reduction <add>, %10, %cst_6 [1] : vector<16x128xf32> to vector<16xf32>
    %12 = vector.shape_cast %11 : vector<16xf32> to vector<16x1xf32>
    %13 = math.log %12 : vector<16x1xf32>
    %14 = vector.broadcast %13 : vector<16x1xf32> to vector<16x128xf32>
    %15 = arith.subf %9, %14 : vector<16x128xf32>
    %c0_7 = arith.constant 0 : index
    %c0_8 = arith.constant 0 : index
    %16 = vector.load %arg4[%c0_7, %c0_8] : memref<16x128xf32, #tpu.memory_space<vmem>>, vector<16x128xf32>
    tpu.vector_store %arg4[%c0_7, %c0_8], %15 {strides = array<i32>} : memref<16x128xf32, #tpu.memory_space<vmem>>, vector<16x128xf32>,
    return
  }
  func.func @transform_0(%arg0: i32) -> (i32, i32) {
    %c0_i32 = arith.constant 0 : i32
    %c0_i32_0 = arith.constant 0 : i32
    return %arg0, %c0_i32 : i32, i32
  }
  func.func @transform_1(%arg0: i32) -> (i32, i32) {
    %c0_i32 = arith.constant 0 : i32
    %c0_i32_0 = arith.constant 0 : i32
    %c0_i32_1 = arith.constant 0 : i32
    return %c0_i32, %c0_i32_0 : i32, i32
  }
  func.func @transform_2(%arg0: i32) -> (i32, i32) {
    %c0_i32 = arith.constant 0 : i32
    %c0_i32_0 = arith.constant 0 : i32
    %c0_i32_1 = arith.constant 0 : i32
    return %c0_i32, %c0_i32_0 : i32, i32
  }
  func.func @transform_3(%arg0: i32) -> (i32, i32) {
    %c0_i32 = arith.constant 0 : i32
    %c0_i32_0 = arith.constant 0 : i32
    return %arg0, %c0_i32 : i32, i32
  }
}

</mosaic_0001>

<bundles_post_ra>
// kernel: generator_forward.1
= control target key start
LH: loop header
LB: loop body
LE: loop exit
PB: predicated region body
PF: predicated region fallthrough
CT: control target
= control target key end

     0   :  { %v185_v1 = vmov 0.0   ;;  %vm186_vm0 = vmmov 0   ;;  %s234_s0 = inlined_call_operand.vmem [shape: bf16[16,32], index: 0, kind: input, shape index: {}]   ;;  %s235_s1 = inlined_call_operand.vmem [shape: bf16[32,128], index: 1, kind: input, shape index: {}]   ;;  %s236_s2 = inlined_call_operand.vmem [shape: f32[1,128], index: 2, kind: input, shape index: {}]   ;;  %s237_s3 = inlined_call_operand.hbm [shape: f32[16,128], index: 3, kind: output, shape index: {}]  }
   0x1   :  { %v150_v0 = vld [vmem:[%s235_s1] sm:$0xff]   ;;  %137 = vmatprep.subr.bf16.mxu0 %v185_v1  ;;  %v151_v2 = vld [vmem:[%s235_s1 + $0x8] sm:$0xff]   ;;  %141 = vmatprep.mubr.msk.bf16.mxu0 %vm186_vm0, %v185_v1 }
   0x2   :  { %138 = vmatpush3.bf16.msra.mxu0 %v150_v0 }
   0x3   :  { %139 = vmatprep.subr.bf16.mxu0 %v185_v1 }
   0x4   :  { %8 = vsyncpa [#allocation3], 0  ;;  %v152_v3 = vld [vmem:[%s234_s0] sm:$0xff]   ;;  %vm46_vm1 = vcmask 261120   ;;  %s187_s0 = smov [#allocation2]  }
   0x5   :  { %v129_v4 = vld [vmem:[%s236_s2] ss:$0 sm:$0xff]  ;;  %s118_s1 = sshll.u32 %s187_s0, 4  ;;  %s119_s1 = int_to_ptr.vmem [resolvable:$true] %s118_s1 }
   0x6   :  { %140 = vmatpush3.bf16.msra.mxu0 %v151_v2  ;;  %s161_s2 = scalar_lea.vmem %s119_s1, 256  ;;  %p166_p1 = scmp.lt.s32.totalorder %s119_s1, %s119_s1 }
   0x7   :  { %p162_p0 = scmp.ne.s32.totalorder %s119_s1, %s161_s2  ;;  %p167_p2 = scmp.lt.s32.totalorder %s161_s2, %s161_s2 }
   0x9   :  { %142 = vmatmul.mubr.msk.bf16.vlgmr.msra.gmra.mrb[0].mxu0 %vm46_vm1, %v152_v3  ;;  %p168_p3 = por %p167_p2, %p166_p1 }
   0xb   :  { %p169_p4 = pnand %p168_p3, %p162_p0 }
  0xdc   :  { %v84_v5 = vpop.f32.mrb[0].mxu0 }
  0xdd   :  { %v85_v6 = vadd.f32 %v129_v4, %v84_v5  ;;  %v143_v7 = vpop.f32.mrb[1].mxu0 }
  0xde   :  { %v87_v8 = vpop.f32.mrb[2].mxu0 }
  0xdf   :  { %91 = vmax.xlane.f32.xlu0 %v85_v6  ;;  %v144_v9 = vpop.f32.mrb[3].mxu0  ;;  %v88_v10 = vadd.f32 %v129_v4, %v87_v8 }
  0xe3   :  { %93 = vmax.xlane.f32.xlu0 %v88_v10 }
 0x16c   :  { %v92_v11 = vpop.xlane.xlu0 %91 }
 0x16d   :  { %v95_v12 = vsub.f32 %v85_v6, %v92_v11 }
 0x16f   :  { %v97_v13 = vmul.f32 1.442695, %v95_v12 }
 0x170   :  { %v94_v14 = vpop.xlane.xlu0 %93 }
 0x171   :  { %v96_v15 = vsub.f32 %v88_v10, %v94_v14  ;;  %153 = vpow2.f32 %v97_v13 }
 0x173   :  { %v99_v16 = vmul.f32 1.442695, %v96_v15 }
 0x175   :  { %155 = vpow2.f32 %v99_v16 }
 0x17b   :  { %v154_v17 = vpop.eup %153 }
 0x17c   :  { %101 = vadd.xlane.f32.xlu1 %v154_v17 }
 0x17f   :  { %v156_v18 = vpop.eup %155 }
 0x180   :  { %103 = vadd.xlane.f32.xlu1 %v156_v18 }
 0x209   :  { %v102_v19 = vpop.xlane.xlu1 %101 }
 0x20a   :  { %157 = vlog2.f32 %v102_v19 }
 0x20d   :  { %v104_v20 = vpop.xlane.xlu1 %103 }
 0x20e   :  { %159 = vlog2.f32 %v104_v20 }
 0x214   :  { %v158_v21 = vpop.eup %157 }
 0x215   :  { %v106_v22 = vmul.f32 0.6931472, %v158_v21 }
 0x217   :  { %v109_v23 = vsub.f32 %v95_v12, %v106_v22 }
 0x218   :  { %v160_v24 = vpop.eup %159 }
 0x219   :  { %111 = vst [vmem:[#allocation2] sm:$0xff] %v109_v23  ;;  %v108_v25 = vmul.f32 0.6931472, %v160_v24 }
 0x21b   :  { %v110_v26 = vsub.f32 %v96_v15, %v108_v25 }
 0x21d   :  { %112 = vst [vmem:[#allocation2 + $0x8] sm:$0xff] %v110_v26 }
 0x21e   :  { %172 = shalt.err (!%p169_p4)
}
 0x21f   :  { %s173_s22 = scalar_lea.hbm %s237_s3, 256 }
 0x220   :  { %p174_p5 = scmp.ne.s32.totalorder %s237_s3, %s173_s22  ;;  %p177_p6 = scmp.lt.u32.totalorder %s173_s22, %s237_s3 }
 0x222   :  { %p179_p7 = pnand %p177_p6, %p174_p5 }
 0x224   :  { %182 = shalt.err (!%p179_p7)
}
 0x225   :  { %s188_s27 = smov 128   ;;  %s189_s28 = smov 8  }
 0x226   :  { %124 = dma.vmem_to_hbm [thread:$0]  %s119_s1, 256, %s237_s3, [#allocation3], %s188_s27, %s188_s27, %s189_s28  }
 0x227   :  { %183 = dma.done.wait [#allocation3], 256  }
 0x228   :  { %184 = vsyncadd [#allocation3], 4294967040 }
 0x229   :  { %128 = vsyncpa [#allocation3], 1 }

</bundles_post_ra>
